<compile_context>
chip_gen: v7x
topology: tpu7x:2x2x1
jax: 0.10.0
libtpu: 0.0.40
codegen_flags: <defaults>
</compile_context>

<pallas_src>
import functools
import math

import jax
import jax.numpy as jnp
from jax.experimental import pallas as pl
from jax.experimental.pallas import tpu as pltpu

# Model configuration (matches the script around MODEL)
INPUT_SIZE = 7                       # 6 state dims + 1 time column
Y_SIZE = 6                           # state dims fed to the kernel (t folded)
HIDDEN_SIZE = [128, 64, 128, 64, 128, 64]
OUTPUT_SIZE = 6
OUT_PAD = 128                        # lane-dense padded output width
BIAS_PAD = 128                       # widest layer; biases packed row-per-layer
DROPOUT_RATE = 0.0                   # identity at p=0


def _round_up(x, m):
    return (x + m - 1) // m * m


def _mlp_kernel(t_ref, y_ref, *refs):
    """refs = (w0, w1, ..., w6, w0_t, bias_pack, o_ref).

    All weights/activations are f32; matmuls accumulate in f32 on the MXU.
    ReLU after every layer except the last.  The last layer's weight is
    zero-padded to 128 output lanes so the final store is lane-dense.
    """
    o_ref = refs[-1]
    b_ref = refs[-2]                         # (7, 128) f32, zero-padded rows
    w0t_ref = refs[-3]                       # (1, 128) f32, time row of W0
    w_refs = refs[:-3]
    n_layers = len(w_refs)

    t = t_ref[0, 0]                          # scalar f32 from SMEM
    h = y_ref[...]                           # (TB, 6) f32
    for i, w_ref in enumerate(w_refs):
        w = w_ref[...]                       # (in_i, out_i) f32
        out_w = w.shape[1]
        acc = jnp.dot(h, w, preferred_element_type=jnp.float32)
        acc = acc + b_ref[i:i + 1, :out_w]   # f32 bias broadcast
        if i == 0:
            # Fold the time column of the input: + t * W0[6, :]
            acc = acc + t * w0t_ref[...]
        if i != n_layers - 1:
            h = jnp.maximum(acc, 0.0)        # ReLU (VPU)
        else:
            h = acc
    # Dropout(p=0) is the identity -> nothing to do.
    o_ref[...] = h.astype(o_ref.dtype)       # (TB, 128) lane-dense store


def init_params(key):
    """Deterministic PyTorch-style init: U(-1/sqrt(fan_in), 1/sqrt(fan_in))."""
    sizes = [INPUT_SIZE] + HIDDEN_SIZE + [OUTPUT_SIZE]
    params = []
    for i in range(len(sizes) - 1):
        fan_in, fan_out = sizes[i], sizes[i + 1]
        key, kw, kb = jax.random.split(key, 3)
        bound = 1.0 / math.sqrt(fan_in)
        w = jax.random.uniform(kw, (fan_in, fan_out), jnp.float32, -bound, bound)
        b = jax.random.uniform(kb, (fan_out,), jnp.float32, -bound, bound)
        params.append((w, b))
    return params


def prepare_params(params):
    """One-time param prep:
       * split W0's time row out (folded in-kernel as t * w0_t),
       * zero-pad the last layer's weight to 128 output lanes (lane-dense),
       * pack all biases into one zero-padded (n_layers, 128) f32 buffer."""
    w0, _ = params[0]                                   # (7, 128)
    w0_t = w0[Y_SIZE:Y_SIZE + 1, :]                     # (1, 128) time row
    weights = [w0[:Y_SIZE, :]]                          # (6, 128)
    weights += [w for (w, _) in params[1:-1]]
    w_last, _ = params[-1]                              # (64, 6)
    w_last_pad = jnp.zeros((w_last.shape[0], OUT_PAD), jnp.float32)
    w_last_pad = w_last_pad.at[:, :OUTPUT_SIZE].set(w_last)
    weights.append(w_last_pad)                          # (64, 128)

    bias_pack = jnp.zeros((len(params), BIAS_PAD), jnp.float32)
    for i, (_, b) in enumerate(params):
        bias_pack = bias_pack.at[i, : b.shape[-1]].set(b)
    return tuple(weights), bias_pack, w0_t


def _pick_block_b(B):
    """Alignment-aware default batch tile."""
    if B <= 64:
        return B                                 # one full-array block
    # Aim for >= 2 grid steps so the "parallel" batch axis shards across the
    # two v7x TensorCores; cap at 2048 rows to stay well inside v5e's VMEM.
    return min(_round_up(pl.cdiv(B, 2), 8), 2048)


@functools.partial(jax.jit, static_argnames=("block_b",))
def model_forward(t, y, weights, bias_pack, w0_t, *, block_b=None):
    """t: scalar f32, y: (B, 6) f32 -> (B, 6) f32."""
    B = y.shape[0]
    if block_b is None:
        block_b = _pick_block_b(B)
    assert block_b == B or block_b % 8 == 0, (
        f"block_b={block_b} must equal B={B} or be a multiple of 8")

    grid = (pl.cdiv(B, block_b),)
    t_arr = jnp.asarray(t, dtype=jnp.float32).reshape(1, 1)

    # Scalar t lives in SMEM; y/out are batch-tiled; weights/biases use a
    # constant block index so they stay VMEM-resident across grid steps.
    t_spec = pl.BlockSpec(memory_space=pltpu.MemorySpace.SMEM)
    y_spec = pl.BlockSpec((block_b, Y_SIZE), lambda i: (i, 0))
    o_spec = pl.BlockSpec((block_b, OUT_PAD), lambda i: (i, 0))
    w_specs = [pl.BlockSpec(w.shape, lambda i: (0, 0)) for w in weights]
    w0t_spec = pl.BlockSpec(w0_t.shape, lambda i: (0, 0))
    b_spec = pl.BlockSpec(bias_pack.shape, lambda i: (0, 0))

    layer_dims = list(zip([Y_SIZE] + HIDDEN_SIZE, HIDDEN_SIZE + [OUT_PAD]))
    flops = 2 * B * sum(k * n for k, n in layer_dims)
    bytes_accessed = int(
        B * (Y_SIZE + OUT_PAD) * 4
        + sum(int(w.size) for w in weights) * 4
        + bias_pack.size * 4 + w0_t.size * 4 + 4)
    cost = pl.CostEstimate(flops=flops, transcendentals=0,
                           bytes_accessed=bytes_accessed)

    out_padded = pl.pallas_call(
        _mlp_kernel,
        out_shape=jax.ShapeDtypeStruct((B, OUT_PAD), jnp.float32),
        grid=grid,
        in_specs=[t_spec, y_spec] + w_specs + [w0t_spec, b_spec],
        out_specs=o_spec,
        compiler_params=pltpu.CompilerParams(
            dimension_semantics=("parallel",),
            vmem_limit_bytes=32 * 1024 * 1024),
        cost_estimate=cost,
    )(t_arr, y, *weights, w0_t, bias_pack)

    # Lane-dense kernel output -> slice back to the 6 real output columns.
    return out_padded[:, :OUTPUT_SIZE]


def reference_forward(t, y, params):
    """Pure-JAX mirror of the PyTorch MODEL.forward (f32 throughout)."""
    tb = jnp.full((y.shape[0], 1), t, dtype=y.dtype)
    h = jnp.concatenate([y, tb], axis=-1)
    n = len(params)
    for i, (w, b) in enumerate(params):
        h = jnp.dot(h, w, preferred_element_type=jnp.float32) + b
        if i != n - 1:
            h = jnp.maximum(h, 0.0)
    # Dropout(p=0) is the identity.
    return h


if __name__ == "__main__":
    key = jax.random.PRNGKey(0)
    params = init_params(key)
    weights, bias_pack, w0_t = prepare_params(params)

    B = 16
    y = jax.random.normal(jax.random.fold_in(key, 123), (B, Y_SIZE),
                          dtype=jnp.float32)
    t = jnp.float32(1.25)

    # block_b=8 forces a 2-step "parallel" batch grid even at this small demo
    # size, exercising the pipelined / dual-TC code path.
    out = model_forward(t, y, weights, bias_pack, w0_t, block_b=8)
    out = jax.block_until_ready(out)

    ref = reference_forward(t, y, params)
    assert out.shape == (B, OUTPUT_SIZE), out.shape
    max_err = float(jnp.max(jnp.abs(out - ref)))
    assert jnp.allclose(out, ref, atol=1e-2, rtol=1e-2), (
        f"max abs err {max_err}")
    print("KERNEL_OK")
</pallas_src>

<mosaic_0001>
module attributes {stable_mosaic.version = 11 : i64} {
  func.func @_mlp_kernel(%arg0: i32, %arg1: memref<1x1xf32, #tpu.memory_space<smem>>, %arg2: memref<8x6xf32, #tpu.memory_space<vmem>>, %arg3: memref<6x128xf32, #tpu.memory_space<vmem>>, %arg4: memref<128x64xf32, #tpu.memory_space<vmem>>, %arg5: memref<64x128xf32, #tpu.memory_space<vmem>>, %arg6: memref<128x64xf32, #tpu.memory_space<vmem>>, %arg7: memref<64x128xf32, #tpu.memory_space<vmem>>, %arg8: memref<128x64xf32, #tpu.memory_space<vmem>>, %arg9: memref<64x128xf32, #tpu.memory_space<vmem>>, %arg10: memref<1x128xf32, #tpu.memory_space<vmem>>, %arg11: memref<7x128xf32, #tpu.memory_space<vmem>>, %arg12: memref<8x128xf32, #tpu.memory_space<vmem>>) attributes {dimension_semantics = [#tpu.dimension_semantics<parallel>], iteration_bounds = array<i64: 2>, scalar_prefetch = 0 : i64, scratch_operands = 0 : i64, tpu.core_type = #tpu.core_type<tc>, window_params = [{transform_indices = @transform_0, window_bounds = array<i64: 1, 1>}, {transform_indices = @transform_1, window_bounds = array<i64: 8, 6>}, {pipeline_mode = #tpu.pipeline_mode<synchronous>, transform_indices = @transform_2, window_bounds = array<i64: 6, 128>}, {pipeline_mode = #tpu.pipeline_mode<synchronous>, transform_indices = @transform_3, window_bounds = array<i64: 128, 64>}, {pipeline_mode = #tpu.pipeline_mode<synchronous>, transform_indices = @transform_4, window_bounds = array<i64: 64, 128>}, {pipeline_mode = #tpu.pipeline_mode<synchronous>, transform_indices = @transform_5, window_bounds = array<i64: 128, 64>}, {pipeline_mode = #tpu.pipeline_mode<synchronous>, transform_indices = @transform_6, window_bounds = array<i64: 64, 128>}, {pipeline_mode = #tpu.pipeline_mode<synchronous>, transform_indices = @transform_7, window_bounds = array<i64: 128, 64>}, {pipeline_mode = #tpu.pipeline_mode<synchronous>, transform_indices = @transform_8, window_bounds = array<i64: 64, 128>}, {pipeline_mode = #tpu.pipeline_mode<synchronous>, transform_indices = @transform_9, window_bounds = array<i64: 1, 128>}, {pipeline_mode = #tpu.pipeline_mode<synchronous>, transform_indices = @transform_10, window_bounds = array<i64: 7, 128>}, {transform_indices = @transform_11, window_bounds = array<i64: 8, 128>}]} {
    %c0 = arith.constant 0 : index
    %c0_0 = arith.constant 0 : index
    %0 = memref.load %arg1[%c0, %c0_0] : memref<1x1xf32, #tpu.memory_space<smem>>
    %c0_1 = arith.constant 0 : index
    %c0_2 = arith.constant 0 : index
    %1 = vector.load %arg2[%c0_1, %c0_2] : memref<8x6xf32, #tpu.memory_space<vmem>>, vector<8x6xf32>
    %c0_3 = arith.constant 0 : index
    %c0_4 = arith.constant 0 : index
    %2 = vector.load %arg3[%c0_3, %c0_4] : memref<6x128xf32, #tpu.memory_space<vmem>>, vector<6x128xf32>
    %cst = arith.constant dense<0.000000e+00> : vector<8x128xf32>
    %3 = tpu.matmul %1, %2, %cst {dimension_numbers = #tpu.dot_dimension_numbers<[1], [0], [0], [1], [0, 0, 1, 1], [], []>} : vector<8x6xf32>, vector<6x128xf32>, vector<8x128xf32> -> vector<8x128xf32>
    %c0_5 = arith.constant 0 : index
    %c0_6 = arith.constant 0 : index
    %4 = vector.load %arg11[%c0_5, %c0_6] : memref<7x128xf32, #tpu.memory_space<vmem>>, vector<1x128xf32>
    %5 = vector.broadcast %4 : vector<1x128xf32> to vector<8x128xf32>
    %6 = arith.addf %3, %5 : vector<8x128xf32>
    %c0_7 = arith.constant 0 : index
    %c0_8 = arith.constant 0 : index
    %7 = vector.load %arg10[%c0_7, %c0_8] : memref<1x128xf32, #tpu.memory_space<vmem>>, vector<1x128xf32>
    %8 = vector.broadcast %0 : f32 to vector<1x128xf32>
    %9 = arith.mulf %8, %7 : vector<1x128xf32>
    %10 = vector.broadcast %9 : vector<1x128xf32> to vector<8x128xf32>
    %11 = arith.addf %6, %10 : vector<8x128xf32>
    %cst_9 = arith.constant 0.000000e+00 : f32
    %12 = vector.broadcast %cst_9 : f32 to vector<8x128xf32>
    %13 = arith.maximumf %11, %12 : vector<8x128xf32>
    %c0_10 = arith.constant 0 : index
    %c0_11 = arith.constant 0 : index
    %14 = vector.load %arg4[%c0_10, %c0_11] : memref<128x64xf32, #tpu.memory_space<vmem>>, vector<128x64xf32>
    %cst_12 = arith.constant dense<0.000000e+00> : vector<8x64xf32>
    %15 = tpu.matmul %13, %14, %cst_12 {dimension_numbers = #tpu.dot_dimension_numbers<[1], [0], [0], [1], [0, 0, 1, 1], [], []>} : vector<8x128xf32>, vector<128x64xf32>, vector<8x64xf32> -> vector<8x64xf32>
    %c1 = arith.constant 1 : index
    %c0_13 = arith.constant 0 : index
    %16 = vector.load %arg11[%c1, %c0_13] : memref<7x128xf32, #tpu.memory_space<vmem>>, vector<1x64xf32>
    %17 = vector.broadcast %16 : vector<1x64xf32> to vector<8x64xf32>
    %18 = arith.addf %15, %17 : vector<8x64xf32>
    %cst_14 = arith.constant 0.000000e+00 : f32
    %19 = vector.broadcast %cst_14 : f32 to vector<8x64xf32>
    %20 = arith.maximumf %18, %19 : vector<8x64xf32>
    %c0_15 = arith.constant 0 : index
    %c0_16 = arith.constant 0 : index
    %21 = vector.load %arg5[%c0_15, %c0_16] : memref<64x128xf32, #tpu.memory_space<vmem>>, vector<64x128xf32>
    %cst_17 = arith.constant dense<0.000000e+00> : vector<8x128xf32>
    %22 = tpu.matmul %20, %21, %cst_17 {dimension_numbers = #tpu.dot_dimension_numbers<[1], [0], [0], [1], [0, 0, 1, 1], [], []>} : vector<8x64xf32>, vector<64x128xf32>, vector<8x128xf32> -> vector<8x128xf32>
    %c2 = arith.constant 2 : index
    %c0_18 = arith.constant 0 : index
    %23 = vector.load %arg11[%c2, %c0_18] : memref<7x128xf32, #tpu.memory_space<vmem>>, vector<1x128xf32>
    %24 = vector.broadcast %23 : vector<1x128xf32> to vector<8x128xf32>
    %25 = arith.addf %22, %24 : vector<8x128xf32>
    %cst_19 = arith.constant 0.000000e+00 : f32
    %26 = vector.broadcast %cst_19 : f32 to vector<8x128xf32>
    %27 = arith.maximumf %25, %26 : vector<8x128xf32>
    %c0_20 = arith.constant 0 : index
    %c0_21 = arith.constant 0 : index
    %28 = vector.load %arg6[%c0_20, %c0_21] : memref<128x64xf32, #tpu.memory_space<vmem>>, vector<128x64xf32>
    %cst_22 = arith.constant dense<0.000000e+00> : vector<8x64xf32>
    %29 = tpu.matmul %27, %28, %cst_22 {dimension_numbers = #tpu.dot_dimension_numbers<[1], [0], [0], [1], [0, 0, 1, 1], [], []>} : vector<8x128xf32>, vector<128x64xf32>, vector<8x64xf32> -> vector<8x64xf32>
    %c3 = arith.constant 3 : index
    %c0_23 = arith.constant 0 : index
    %30 = vector.load %arg11[%c3, %c0_23] : memref<7x128xf32, #tpu.memory_space<vmem>>, vector<1x64xf32>
    %31 = vector.broadcast %30 : vector<1x64xf32> to vector<8x64xf32>
    %32 = arith.addf %29, %31 : vector<8x64xf32>
    %cst_24 = arith.constant 0.000000e+00 : f32
    %33 = vector.broadcast %cst_24 : f32 to vector<8x64xf32>
    %34 = arith.maximumf %32, %33 : vector<8x64xf32>
    %c0_25 = arith.constant 0 : index
    %c0_26 = arith.constant 0 : index
    %35 = vector.load %arg7[%c0_25, %c0_26] : memref<64x128xf32, #tpu.memory_space<vmem>>, vector<64x128xf32>
    %cst_27 = arith.constant dense<0.000000e+00> : vector<8x128xf32>
    %36 = tpu.matmul %34, %35, %cst_27 {dimension_numbers = #tpu.dot_dimension_numbers<[1], [0], [0], [1], [0, 0, 1, 1], [], []>} : vector<8x64xf32>, vector<64x128xf32>, vector<8x128xf32> -> vector<8x128xf32>
    %c4 = arith.constant 4 : index
    %c0_28 = arith.constant 0 : index
    %37 = vector.load %arg11[%c4, %c0_28] : memref<7x128xf32, #tpu.memory_space<vmem>>, vector<1x128xf32>
    %38 = vector.broadcast %37 : vector<1x128xf32> to vector<8x128xf32>
    %39 = arith.addf %36, %38 : vector<8x128xf32>
    %cst_29 = arith.constant 0.000000e+00 : f32
    %40 = vector.broadcast %cst_29 : f32 to vector<8x128xf32>
    %41 = arith.maximumf %39, %40 : vector<8x128xf32>
    %c0_30 = arith.constant 0 : index
    %c0_31 = arith.constant 0 : index
    %42 = vector.load %arg8[%c0_30, %c0_31] : memref<128x64xf32, #tpu.memory_space<vmem>>, vector<128x64xf32>
    %cst_32 = arith.constant dense<0.000000e+00> : vector<8x64xf32>
    %43 = tpu.matmul %41, %42, %cst_32 {dimension_numbers = #tpu.dot_dimension_numbers<[1], [0], [0], [1], [0, 0, 1, 1], [], []>} : vector<8x128xf32>, vector<128x64xf32>, vector<8x64xf32> -> vector<8x64xf32>
    %c5 = arith.constant 5 : index
    %c0_33 = arith.constant 0 : index
    %44 = vector.load %arg11[%c5, %c0_33] : memref<7x128xf32, #tpu.memory_space<vmem>>, vector<1x64xf32>
    %45 = vector.broadcast %44 : vector<1x64xf32> to vector<8x64xf32>
    %46 = arith.addf %43, %45 : vector<8x64xf32>
    %cst_34 = arith.constant 0.000000e+00 : f32
    %47 = vector.broadcast %cst_34 : f32 to vector<8x64xf32>
    %48 = arith.maximumf %46, %47 : vector<8x64xf32>
    %c0_35 = arith.constant 0 : index
    %c0_36 = arith.constant 0 : index
    %49 = vector.load %arg9[%c0_35, %c0_36] : memref<64x128xf32, #tpu.memory_space<vmem>>, vector<64x128xf32>
    %cst_37 = arith.constant dense<0.000000e+00> : vector<8x128xf32>
    %50 = tpu.matmul %48, %49, %cst_37 {dimension_numbers = #tpu.dot_dimension_numbers<[1], [0], [0], [1], [0, 0, 1, 1], [], []>} : vector<8x64xf32>, vector<64x128xf32>, vector<8x128xf32> -> vector<8x128xf32>
    %c6 = arith.constant 6 : index
    %c0_38 = arith.constant 0 : index
    %51 = vector.load %arg11[%c6, %c0_38] : memref<7x128xf32, #tpu.memory_space<vmem>>, vector<1x128xf32>
    %52 = vector.broadcast %51 : vector<1x128xf32> to vector<8x128xf32>
    %53 = arith.addf %50, %52 : vector<8x128xf32>
    %c0_39 = arith.constant 0 : index
    %c0_40 = arith.constant 0 : index
    %54 = vector.load %arg12[%c0_39, %c0_40] : memref<8x128xf32, #tpu.memory_space<vmem>>, vector<8x128xf32>
    tpu.vector_store %arg12[%c0_39, %c0_40], %53 {strides = array<i32>} : memref<8x128xf32, #tpu.memory_space<vmem>>, vector<8x128xf32>,
    return
  }
  func.func @transform_0(%arg0: i32) -> (i32, i32) {
    %c0_i32 = arith.constant 0 : i32
    %c0_i32_0 = arith.constant 0 : i32
    %c0_i32_1 = arith.constant 0 : i32
    return %c0_i32, %c0_i32_0 : i32, i32
  }
  func.func @transform_1(%arg0: i32) -> (i32, i32) {
    %c0_i32 = arith.constant 0 : i32
    %c0_i32_0 = arith.constant 0 : i32
    return %arg0, %c0_i32 : i32, i32
  }
  func.func @transform_2(%arg0: i32) -> (i32, i32) {
    %c0_i32 = arith.constant 0 : i32
    %c0_i32_0 = arith.constant 0 : i32
    %c0_i32_1 = arith.constant 0 : i32
    return %c0_i32, %c0_i32_0 : i32, i32
  }
  func.func @transform_3(%arg0: i32) -> (i32, i32) {
    %c0_i32 = arith.constant 0 : i32
    %c0_i32_0 = arith.constant 0 : i32
    %c0_i32_1 = arith.constant 0 : i32
    return %c0_i32, %c0_i32_0 : i32, i32
  }
  func.func @transform_4(%arg0: i32) -> (i32, i32) {
    %c0_i32 = arith.constant 0 : i32
    %c0_i32_0 = arith.constant 0 : i32
    %c0_i32_1 = arith.constant 0 : i32
    return %c0_i32, %c0_i32_0 : i32, i32
  }
  func.func @transform_5(%arg0: i32) -> (i32, i32) {
    %c0_i32 = arith.constant 0 : i32
    %c0_i32_0 = arith.constant 0 : i32
    %c0_i32_1 = arith.constant 0 : i32
    return %c0_i32, %c0_i32_0 : i32, i32
  }
  func.func @transform_6(%arg0: i32) -> (i32, i32) {
    %c0_i32 = arith.constant 0 : i32
    %c0_i32_0 = arith.constant 0 : i32
    %c0_i32_1 = arith.constant 0 : i32
    return %c0_i32, %c0_i32_0 : i32, i32
  }
  func.func @transform_7(%arg0: i32) -> (i32, i32) {
    %c0_i32 = arith.constant 0 : i32
    %c0_i32_0 = arith.constant 0 : i32
    %c0_i32_1 = arith.constant 0 : i32
    return %c0_i32, %c0_i32_0 : i32, i32
  }
  func.func @transform_8(%arg0: i32) -> (i32, i32) {
    %c0_i32 = arith.constant 0 : i32
    %c0_i32_0 = arith.constant 0 : i32
    %c0_i32_1 = arith.constant 0 : i32
    return %c0_i32, %c0_i32_0 : i32, i32
  }
  func.func @transform_9(%arg0: i32) -> (i32, i32) {
    %c0_i32 = arith.constant 0 : i32
    %c0_i32_0 = arith.constant 0 : i32
    %c0_i32_1 = arith.constant 0 : i32
    return %c0_i32, %c0_i32_0 : i32, i32
  }
  func.func @transform_10(%arg0: i32) -> (i32, i32) {
    %c0_i32 = arith.constant 0 : i32
    %c0_i32_0 = arith.constant 0 : i32
    %c0_i32_1 = arith.constant 0 : i32
    return %c0_i32, %c0_i32_0 : i32, i32
  }
  func.func @transform_11(%arg0: i32) -> (i32, i32) {
    %c0_i32 = arith.constant 0 : i32
    %c0_i32_0 = arith.constant 0 : i32
    return %arg0, %c0_i32 : i32, i32
  }
}

</mosaic_0001>

<bundles_post_ra>
// kernel: model_forward.1
= control target key start
LH: loop header
LB: loop body
LE: loop exit
PB: predicated region body
PF: predicated region fallthrough
CT: control target
= control target key end

     0   :  { %s1532_s19 = smov 0   ;;  %s1853_s0 = inlined_call_operand.<no memory space> [shape: f32[1,1], index: 0, kind: input, shape index: {}]   ;;  %s1854_s1 = inlined_call_operand.vmem [shape: f32[16,6], index: 1, kind: input, shape index: {}]   ;;  %s1855_s2 = inlined_call_operand.vmem [shape: f32[6,128], index: 2, kind: input, shape index: {}]   ;;  %s1856_s3 = inlined_call_operand.vmem [shape: f32[128,64], index: 3, kind: input, shape index: {}]   ;;  %s1857_s4 = inlined_call_operand.vmem [shape: f32[64,128], index: 4, kind: input, shape index: {}]   ;;  %s1858_s5 = inlined_call_operand.vmem [shape: f32[128,64], index: 5, kind: input, shape index: {}]   ;;  %s1859_s6 = inlined_call_operand.vmem [shape: f32[64,128], index: 6, kind: input, shape index: {}]   ;;  %s1860_s7 = inlined_call_operand.vmem [shape: f32[128,64], index: 7, kind: input, shape index: {}]   ;;  %s1861_s8 = inlined_call_operand.vmem [shape: f32[64,128], index: 8, kind: input, shape index: {}]   ;;  %s1862_s9 = inlined_call_operand.vmem [shape: f32[1,128], index: 9, kind: input, shape index: {}]   ;;  %s1863_s10 = inlined_call_operand.vmem [shape: f32[7,128], index: 10, kind: input, shape index: {}]   ;;  %s1864_s11 = inlined_call_operand.vmem [shape: f32[16,128], index: 11, kind: output, shape index: {}]  }
   0x1   :  { %16 = sst [smem:[#allocation2]] %s1853_s0 }
   0x2 LB: > { %s1071_s20 = sadd.s32 4294967295, %s1464_s19   ;;  %p1075_p0 = scmp.ge.s32.totalorder %s1464_s19, 1  ;;  %s1464_s19 = sphi %s1532_s19, %s22_s19  }
   0x3   : > { %p337_p1 = scmp.lt.s32.totalorder %s1464_s19, 3 }
   0x5   : > { %p338_p2 = pnand %p1075_p0, %p337_p1 }
   0x6   : > { %v385_v0 = vld [vmem:[%s1855_s2] sm:$0x3f] (!%p338_p2)  ;;  %vm395_vm0 = vcmask (!%p338_p2), 1045504   ;;  %p375_p3 = scmp.lt.s32.totalorder (!%p338_p2), %s1071_s20, 1  ;;  %v1466_v1 = vmov (!%p338_p2), 0.0   ;;  %vm1467_vm1 = vmmov (!%p338_p2), 0   ;;  %v473_v37 = vlaneseq (!%p338_p2) }
   0x7   : > { %341 = sbr.rel (%p338_p2) target bundleno = 1531 (0x5fb), region = 64  ;;  %1172 = vmatprep.subr.mxu0 (!%p338_p2), %v1466_v1  ;;  %1174 = vmatprep.mubr.msk.f32.mxu0 (!%p338_p2), %vm1467_vm1, %v1466_v1  ;;  %v480_v2 = vld [vmem:[%s1856_s3] sm:$0xff] (!%p338_p2)  ;;  %v481_v3 = vld [vmem:[%s1856_s3 + $0x8] sm:$0xff] (!%p338_p2)  ;;  %v482_v4 = vld [vmem:[%s1856_s3 + $0x10] sm:$0xff] (!%p338_p2)  ;;  %v1468_v5 = vmov (!%p338_p2), 0.0|0.0   ;;  %vm391_vm2 = vcmask (!%p338_p2), 48128  }
   0x8   : > { %1173 = vmatpush3.msk.msra.mxu0 (!%p338_p2), %vm395_vm0, %v385_v0  ;;  %1339 = vmatprep.subr.bf16.mxu1 (!%p338_p2), %v1468_v5  ;;  %v1340_v6 = vpack.c.bf16 (!%p338_p2), %v481_v3, %v480_v2  ;;  %v483_v7 = vld [vmem:[%s1856_s3 + $0x18] sm:$0xff] (!%p338_p2)  ;;  %v484_v9 = vld [vmem:[%s1856_s3 + $0x20] sm:$0xff] (!%p338_p2)  ;;  %v485_v10 = vld [vmem:[%s1856_s3 + $0x28] sm:$0xff] (!%p338_p2)  ;;  %s383_s17 = sld [smem:[#allocation2]] (!%p338_p2)  ;;  %v474_v38 = vshrl.u32 (!%p338_p2), %v473_v37, 7  ;;  %vm585_vm3 = vcmask (!%p338_p2), 523264  }
   0x9   : > { %1209 = vmatprep.mubr.msk.f32.mxu1 (!%p338_p2), %vm1467_vm1, %v1466_v1  ;;  %1363 = vmatprep.subr.bf16.mxu0 (!%p338_p2), %v1468_v5  ;;  %v1343_v8 = vpack.c.bf16 (!%p338_p2), %v483_v7, %v482_v4  ;;  %v1346_v12 = vpack.c.bf16 (!%p338_p2), %v485_v10, %v484_v9  ;;  %v486_v13 = vld [vmem:[%s1856_s3 + $0x30] sm:$0xff] (!%p338_p2)  ;;  %v487_v14 = vld [vmem:[%s1856_s3 + $0x38] sm:$0xff] (!%p338_p2)  ;;  %v488_v16 = vld [vmem:[%s1856_s3 + $0x40] sm:$0xff] (!%p338_p2) }
   0xa   : > { %1341 = vmatpush3.bf16.msra.mxu1 (!%p338_p2), %v1340_v6  ;;  %v1349_v15 = vpack.c.bf16 (!%p338_p2), %v487_v14, %v486_v13  ;;  %v489_v17 = vld [vmem:[%s1856_s3 + $0x48] sm:$0xff] (!%p338_p2)  ;;  %v490_v19 = vld [vmem:[%s1856_s3 + $0x50] sm:$0xff] (!%p338_p2)  ;;  %v491_v20 = vld [vmem:[%s1856_s3 + $0x58] sm:$0xff] (!%p338_p2)  ;;  %v475_v42 = vsub.s32 (!%p338_p2), 0, %v474_v38 }
   0xb   : > { %1342 = vmatprep.subr.bf16.mxu1 (!%p338_p2), %v1468_v5  ;;  %v1352_v18 = vpack.c.bf16 (!%p338_p2), %v489_v17, %v488_v16  ;;  %v1355_v21 = vpack.c.bf16 (!%p338_p2), %v491_v20, %v490_v19  ;;  %v492_v22 = vld [vmem:[%s1856_s3 + $0x60] sm:$0xff] (!%p338_p2)  ;;  %v493_v23 = vld [vmem:[%s1856_s3 + $0x68] sm:$0xff] (!%p338_p2)  ;;  %v494_v25 = vld [vmem:[%s1856_s3 + $0x70] sm:$0xff] (!%p338_p2) }
   0xc   : > { %v1358_v24 = vpack.c.bf16 (!%p338_p2), %v493_v23, %v492_v22  ;;  %v495_v26 = vld [vmem:[%s1856_s3 + $0x78] sm:$0xff] (!%p338_p2)  ;;  %v572_v28 = vld [vmem:[%s1857_s4] sm:$0xff] (!%p338_p2)  ;;  %v573_v29 = vld [vmem:[%s1857_s4 + $0x8] sm:$0xff] (!%p338_p2) }
   0xd   : > { %v1361_v27 = vpack.c.bf16 (!%p338_p2), %v495_v26, %v494_v25  ;;  %v574_v30 = vld [vmem:[%s1857_s4 + $0x10] sm:$0xff] (!%p338_p2)  ;;  %v1364_v31 = vpack.c.bf16 (!%p338_p2), %v573_v29, %v572_v28  ;;  %v575_v32 = vld [vmem:[%s1857_s4 + $0x18] sm:$0xff] (!%p338_p2)  ;;  %v576_v34 = vld [vmem:[%s1857_s4 + $0x20] sm:$0xff] (!%p338_p2) }
   0xe   : > { %s1866_s20 = smov (!%p375_p3, %s1071_s20), 1  ;;  %1344 = vmatpush3.bf16.msra.mxu1 %v1343_v8  ;;  %v1367_v33 = vpack.c.bf16 %v575_v32, %v574_v30  ;;  %v577_v35 = vld [vmem:[%s1857_s4 + $0x28] sm:$0xff]  ;;  %v469_v39 = vld [vmem:[%s1862_s9] sm:$0x1]  ;;  %v470_v40 = vstv %s383_s17  ;;  %v578_v50 = vld [vmem:[%s1857_s4 + $0x30] sm:$0xff] }
   0xf   : > { %s1076_s30 = sshll.u32 %s1866_s20, 3  ;;  %1345 = vmatprep.subr.bf16.mxu1 %v1468_v5  ;;  %v1370_v36 = vpack.c.bf16 %v577_v35, %v576_v34  ;;  %v471_v41 = vmul.f32 %v470_v40, %v469_v39  ;;  %v1078_v43 = vld [vmem:[%s1863_s10] ss:$0 sm:$0xff]  ;;  %v579_v51 = vld [vmem:[%s1857_s4 + $0x38] sm:$0xff]  ;;  %v1081_v53 = vld [vmem:[%s1863_s10 + $0x1] ss:$0 sm:$0xff] }
  0x10   : > { %s378_s14 = scalar_lea.vmem %s1854_s1, %s1076_s30  ;;  %v1373_v52 = vpack.c.bf16 %v579_v51, %v578_v50  ;;  %v660_v54 = vld [vmem:[%s1858_s5] sm:$0xff]  ;;  %v661_v55 = vld [vmem:[%s1858_s5 + $0x8] sm:$0xff]  ;;  %v662_v61 = vld [vmem:[%s1858_s5 + $0x10] sm:$0xff]  ;;  %s382_s17 = scalar_lea.vmem %s1864_s11, %s1076_s30 }
  0x11   : > { %v384_v11 = vld [vmem:[%s378_s14] sm:$0xff]  ;;  %v476_v44 = vrot.slane %v471_v41, %v475_v42  ;;  %v1376_v59 = vpack.c.bf16 %v661_v55, %v660_v54  ;;  %v663_v62 = vld [vmem:[%s1858_s5 + $0x18] sm:$0xff]  ;;  %v665_v2 = vld [vmem:[%s1858_s5 + $0x28] sm:$0xff] }
  0x12   : > { %1175 = vmatmul.mubr.msk.f32.vlgmr.msra.gmra.mrb[0].mxu0 %vm391_vm2, %v384_v11  ;;  %1347 = vmatpush3.bf16.msra.mxu1 %v1346_v12  ;;  %v1379_v63 = vpack.c.bf16 %v663_v62, %v662_v61  ;;  %v664_v0 = vld [vmem:[%s1858_s5 + $0x20] sm:$0xff]  ;;  %v666_v4 = vld [vmem:[%s1858_s5 + $0x30] sm:$0xff]  ;;  %v667_v6 = vld [vmem:[%s1858_s5 + $0x38] sm:$0xff] }
  0x13   : > { %1228 = vmatprep.mubr.msk.f32.mxu0 %vm1467_vm1, %v1466_v1  ;;  %1348 = vmatprep.subr.bf16.mxu1 %v1468_v5  ;;  %v1382_v3 = vpack.c.bf16 %v665_v2, %v664_v0  ;;  %v1385_v7 = vpack.c.bf16 %v667_v6, %v666_v4  ;;  %v668_v8 = vld [vmem:[%s1858_s5 + $0x40] sm:$0xff]  ;;  %v669_v9 = vld [vmem:[%s1858_s5 + $0x48] sm:$0xff]  ;;  %v670_v11 = vld [vmem:[%s1858_s5 + $0x50] sm:$0xff] }
  0x14   : > { %1365 = vmatpush3.bf16.msra.mxu0 %v1364_v31  ;;  %v1388_v10 = vpack.c.bf16 %v669_v9, %v668_v8  ;;  %v671_v12 = vld [vmem:[%s1858_s5 + $0x58] sm:$0xff]  ;;  %v672_v14 = vld [vmem:[%s1858_s5 + $0x60] sm:$0xff]  ;;  %v674_v17 = vld [vmem:[%s1858_s5 + $0x70] sm:$0xff] }
  0x15   : > { %1366 = vmatprep.subr.bf16.mxu0 %v1468_v5  ;;  %v1391_v13 = vpack.c.bf16 %v671_v12, %v670_v11  ;;  %v752_v20 = vld [vmem:[%s1859_s6] sm:$0xff]  ;;  %v754_v22 = vld [vmem:[%s1859_s6 + $0x10] sm:$0xff]  ;;  %v759_v35 = vld [vmem:[%s1859_s6 + $0x38] sm:$0xff] }
  0x16   : > { %1350 = vmatpush3.bf16.msra.mxu1 %v1349_v15  ;;  %v673_v15 = vld [vmem:[%s1858_s5 + $0x68] sm:$0xff]  ;;  %v756_v26 = vld [vmem:[%s1859_s6 + $0x20] sm:$0xff]  ;;  %v758_v34 = vld [vmem:[%s1859_s6 + $0x30] sm:$0xff] }
  0x17   : > { %1351 = vmatprep.subr.bf16.mxu1 %v1468_v5  ;;  %v1394_v16 = vpack.c.bf16 %v673_v15, %v672_v14  ;;  %v1082_v29 = vld [vmem:[%s1863_s10 + $0x2] ss:$0 sm:$0xff]  ;;  %v1084_v37 = vld [vmem:[%s1863_s10 + $0x3] ss:$0 sm:$0xff]  ;;  %v840_v39 = vld [vmem:[%s1860_s7 + $0x8] sm:$0xff] }
  0x18   : > { %1368 = vmatpush3.bf16.msra.mxu0 %v1367_v33  ;;  %v839_v38 = vld [vmem:[%s1860_s7] sm:$0xff]  ;;  %v845_v51 = vld [vmem:[%s1860_s7 + $0x30] sm:$0xff]  ;;  %v848_v54 = vld [vmem:[%s1860_s7 + $0x48] sm:$0xff] }
  0x19   : > { %1369 = vmatprep.subr.bf16.mxu0 %v1468_v5  ;;  %v853_v62 = vld [vmem:[%s1860_s7 + $0x70] sm:$0xff]  ;;  %v931_v2 = vld [vmem:[%s1861_s8] sm:$0xff] }
  0x1a   : > { %1353 = vmatpush3.bf16.msra.mxu1 %v1352_v18  ;;  %v675_v18 = vld [vmem:[%s1858_s5 + $0x78] sm:$0xff]  ;;  %v933_v4 = vld [vmem:[%s1861_s8 + $0x10] sm:$0xff]  ;;  %v935_v9 = vld [vmem:[%s1861_s8 + $0x20] sm:$0xff] }
  0x1b   : > { %1354 = vmatprep.subr.bf16.mxu1 %v1468_v5  ;;  %v1397_v19 = vpack.c.bf16 %v675_v18, %v674_v17  ;;  %v1085_v12 = vld [vmem:[%s1863_s10 + $0x4] ss:$0 sm:$0xff]  ;;  %v937_v17 = vld [vmem:[%s1861_s8 + $0x30] sm:$0xff]  ;;  %v938_v18 = vld [vmem:[%s1861_s8 + $0x38] sm:$0xff] }
  0x1c   : > { %1371 = vmatpush3.bf16.msra.mxu0 %v1370_v36  ;;  %v1409_v36 = vpack.c.bf16 %v759_v35, %v758_v34 }
  0x1d   : > { %1372 = vmatprep.subr.bf16.mxu0 %v1468_v5 }
  0x1e   : > { %1356 = vmatpush3.bf16.msra.mxu1 %v1355_v21  ;;  %v753_v21 = vld [vmem:[%s1859_s6 + $0x8] sm:$0xff] }
  0x1f   : > { %1357 = vmatprep.subr.bf16.mxu1 %v1468_v5  ;;  %v1400_v23 = vpack.c.bf16 %v753_v21, %v752_v20 }
  0x20   : > { %1374 = vmatpush3.bf16.msra.mxu0 %v1373_v52 }
  0x21   : > { %1375 = vmatprep.subr.bf16.mxu0 %v1468_v5 }
  0x22   : > { %1359 = vmatpush3.bf16.msra.mxu1 %v1358_v24  ;;  %v755_v24 = vld [vmem:[%s1859_s6 + $0x18] sm:$0xff] }
  0x23   : > { %1360 = vmatprep.subr.bf16.mxu1 %v1468_v5  ;;  %v1403_v25 = vpack.c.bf16 %v755_v24, %v754_v22  ;;  %v1088_v24 = vld [vmem:[%s1863_s10 + $0x6] ss:$0 sm:$0xff] }
  0x26   : > { %1362 = vmatpush3.bf16.msra.mxu1 %v1361_v27  ;;  %v757_v27 = vld [vmem:[%s1859_s6 + $0x28] sm:$0xff] }
  0x27   : > { %1399 = vmatprep.subr.bf16.mxu1 %v1468_v5  ;;  %v1406_v28 = vpack.c.bf16 %v757_v27, %v756_v26 }
  0xe5   : > { %v465_v45 = vpop.f32.mrb[0].mxu0 }
  0xe6   : > { %v466_v46 = vadd.f32 %v1078_v43, %v465_v45  ;;  %v1176_v47 = vpop.f32.mrb[1].mxu0  ;;  %v1412_v43 = vpack.c.bf16 %v840_v39, %v839_v38  ;;  %v841_v45 = vld [vmem:[%s1860_s7 + $0x10] sm:$0xff] }
  0xe8   : > { %v478_v48 = vadd.f32 %v476_v44, %v466_v46  ;;  %v842_v46 = vld [vmem:[%s1860_s7 + $0x18] sm:$0xff] }
  0xe9   : > { %v1415_v47 = vpack.c.bf16 %v842_v46, %v841_v45 }
  0xea   : > { %v479_v49 = vmax.f32 %v478_v48, 0.0  ;;  %v843_v48 = vld [vmem:[%s1860_s7 + $0x20] sm:$0xff] }
  0xec   : > { %1210 = vmatmul.mubr.f32.vlgmr.msra.gmra.mrb[0].mxu1 %v479_v49  ;;  %v844_v49 = vld [vmem:[%s1860_s7 + $0x28] sm:$0xff] }
  0xed   : > { %1282 = vmatprep.mubr.msk.f32.mxu1 %vm1467_vm1, %v1466_v1  ;;  %1401 = vmatpush3.bf16.msra.mxu1 %v1400_v23  ;;  %v1418_v50 = vpack.c.bf16 %v844_v49, %v843_v48 }
  0xee   : > { %1402 = vmatprep.subr.bf16.mxu1 %v1468_v5 }
  0xf1   : > { %1404 = vmatpush3.bf16.msra.mxu1 %v1403_v25 }
  0xf2   : > { %1405 = vmatprep.subr.bf16.mxu1 %v1468_v5 }
  0xf5   : > { %1407 = vmatpush3.bf16.msra.mxu1 %v1406_v28 }
  0xf6   : > { %1408 = vmatprep.subr.bf16.mxu1 %v1468_v5 }
  0xf9   : > { %1410 = vmatpush3.bf16.msra.mxu1 %v1409_v36 }
  0xfa   : > { %1411 = vmatprep.subr.bf16.mxu1 %v1468_v5 }
 0x1bf   : > { %v567_v56 = vpop.f32.mrb[0].mxu1 }
 0x1c0   : > { %v568_v57 = vadd.f32 %v1081_v53, %v567_v56  ;;  %v1211_v58 = vpop.f32.mrb[1].mxu1  ;;  %v847_v53 = vld [vmem:[%s1860_s7 + $0x40] sm:$0xff]  ;;  %v849_v56 = vld [vmem:[%s1860_s7 + $0x50] sm:$0xff] }
 0x1c1   : > { %v1424_v55 = vpack.c.bf16 %v848_v54, %v847_v53 }
 0x1c2   : > { %v571_v60 = vmax.f32 %v568_v57, 0.0  ;;  %v850_v57 = vld [vmem:[%s1860_s7 + $0x58] sm:$0xff] }
 0x1c3   : > { %v1427_v58 = vpack.c.bf16 %v850_v57, %v849_v56 }
 0x1c4   : > { %1229 = vmatmul.mubr.msk.f32.vlgmr.msra.gmra.mrb[2].mxu0 %vm585_vm3, %v571_v60  ;;  %v852_v60 = vld [vmem:[%s1860_s7 + $0x68] sm:$0xff] }
 0x1c5   : > { %1377 = vmatpush3.bf16.msra.mxu0 %v1376_v59  ;;  %1263 = vmatprep.mubr.msk.f32.mxu0 %vm1467_vm1, %v1466_v1  ;;  %v851_v59 = vld [vmem:[%s1860_s7 + $0x60] sm:$0xff] }
 0x1c6   : > { %1378 = vmatprep.subr.bf16.mxu0 %v1468_v5  ;;  %v1430_v61 = vpack.c.bf16 %v852_v60, %v851_v59 }
 0x1c9   : > { %1380 = vmatpush3.bf16.msra.mxu0 %v1379_v63  ;;  %v854_v63 = vld [vmem:[%s1860_s7 + $0x78] sm:$0xff] }
 0x1ca   : > { %1381 = vmatprep.subr.bf16.mxu0 %v1468_v5  ;;  %v1433_v0 = vpack.c.bf16 %v854_v63, %v853_v62 }
 0x1cd   : > { %1383 = vmatpush3.bf16.msra.mxu0 %v1382_v3  ;;  %v932_v3 = vld [vmem:[%s1861_s8 + $0x8] sm:$0xff] }
 0x1ce   : > { %1384 = vmatprep.subr.bf16.mxu0 %v1468_v5  ;;  %v1436_v6 = vpack.c.bf16 %v932_v3, %v931_v2 }
 0x1d1   : > { %1386 = vmatpush3.bf16.msra.mxu0 %v1385_v7  ;;  %v934_v7 = vld [vmem:[%s1861_s8 + $0x18] sm:$0xff] }
 0x1d2   : > { %1387 = vmatprep.subr.bf16.mxu0 %v1468_v5  ;;  %v1439_v8 = vpack.c.bf16 %v934_v7, %v933_v4 }
 0x1d5   : > { %1389 = vmatpush3.bf16.msra.mxu0 %v1388_v10  ;;  %v936_v10 = vld [vmem:[%s1861_s8 + $0x28] sm:$0xff] }
 0x1d6   : > { %1390 = vmatprep.subr.bf16.mxu0 %v1468_v5  ;;  %v1442_v11 = vpack.c.bf16 %v936_v10, %v935_v9 }
 0x1d9   : > { %1392 = vmatpush3.bf16.msra.mxu0 %v1391_v13 }
 0x1da   : > { %1393 = vmatprep.subr.bf16.mxu0 %v1468_v5 }
 0x1dd   : > { %1395 = vmatpush3.bf16.msra.mxu0 %v1394_v16 }
 0x1de   : > { %1396 = vmatprep.subr.bf16.mxu0 %v1468_v5 }
 0x1e1   : > { %1398 = vmatpush3.bf16.msra.mxu0 %v1397_v19  ;;  %v1445_v19 = vpack.c.bf16 %v938_v18, %v937_v17 }
 0x1e2   : > { %1435 = vmatprep.subr.bf16.mxu0 %v1468_v5 }
 0x297   : > { %v655_v30 = vpop.f32.mrb[2].mxu0 }
 0x298   : > { %v656_v31 = vadd.f32 %v1082_v29, %v655_v30  ;;  %v1230_v32 = vpop.f32.mrb[3].mxu0 }
 0x29a   : > { %v659_v33 = vmax.f32 %v656_v31, 0.0 }
 0x29c   : > { %1264 = vmatmul.mubr.f32.vlgmr.msra.gmra.mrb[4].mxu0 %v659_v33 }
 0x29d   : > { %1336 = vmatprep.mubr.msk.f32.mxu0 %vm1467_vm1, %v1466_v1  ;;  %1437 = vmatpush3.bf16.msra.mxu0 %v1436_v6 }
 0x29e   : > { %1438 = vmatprep.subr.bf16.mxu0 %v1468_v5 }
 0x2a1   : > { %1440 = vmatpush3.bf16.msra.mxu0 %v1439_v8 }
 0x2a2   : > { %1441 = vmatprep.subr.bf16.mxu0 %v1468_v5 }
 0x2a5   : > { %1443 = vmatpush3.bf16.msra.mxu0 %v1442_v11 }
 0x2a6   : > { %1444 = vmatprep.subr.bf16.mxu0 %v1468_v5 }
 0x2a9   : > { %1446 = vmatpush3.bf16.msra.mxu0 %v1445_v19 }
 0x36f   : > { %v747_v40 = vpop.f32.mrb[4].mxu0 }
 0x370   : > { %v748_v41 = vadd.f32 %v1084_v37, %v747_v40  ;;  %v1265_v42 = vpop.f32.mrb[5].mxu0 }
 0x372   : > { %v751_v44 = vmax.f32 %v748_v41, 0.0 }
 0x374   : > { %1283 = vmatmul.mubr.msk.f32.vlgmr.msra.gmra.mrb[2].mxu1 %vm585_vm3, %v751_v44 }
 0x375   : > { %1413 = vmatpush3.bf16.msra.mxu1 %v1412_v43  ;;  %1317 = vmatprep.mubr.msk.f32.mxu1 %vm1467_vm1, %v1466_v1  ;;  %v846_v1 = vld [vmem:[%s1860_s7 + $0x38] sm:$0xff] }
 0x376   : > { %1414 = vmatprep.subr.bf16.mxu1 %v1468_v5  ;;  %v1421_v52 = vpack.c.bf16 %v846_v1, %v845_v51 }
 0x379   : > { %1416 = vmatpush3.bf16.msra.mxu1 %v1415_v47 }
 0x37a   : > { %1417 = vmatprep.subr.bf16.mxu1 %v1468_v5 }
 0x37d   : > { %1419 = vmatpush3.bf16.msra.mxu1 %v1418_v50 }
 0x37e   : > { %1420 = vmatprep.subr.bf16.mxu1 %v1468_v5 }
 0x381   : > { %1422 = vmatpush3.bf16.msra.mxu1 %v1421_v52 }
 0x382   : > { %1423 = vmatprep.subr.bf16.mxu1 %v1468_v5 }
 0x385   : > { %1425 = vmatpush3.bf16.msra.mxu1 %v1424_v55 }
 0x386   : > { %1426 = vmatprep.subr.bf16.mxu1 %v1468_v5 }
 0x389   : > { %1428 = vmatpush3.bf16.msra.mxu1 %v1427_v58 }
 0x38a   : > { %1429 = vmatprep.subr.bf16.mxu1 %v1468_v5 }
 0x38d   : > { %1431 = vmatpush3.bf16.msra.mxu1 %v1430_v61 }
 0x38e   : > { %1432 = vmatprep.subr.bf16.mxu1 %v1468_v5  ;;  %v1087_v5 = vld [vmem:[%s1863_s10 + $0x5] ss:$0 sm:$0xff] }
 0x391   : > { %1434 = vmatpush3.bf16.msra.mxu1 %v1433_v0 }
 0x447   : > { %v834_v13 = vpop.f32.mrb[2].mxu1 }
 0x448   : > { %v835_v14 = vadd.f32 %v1085_v12, %v834_v13  ;;  %v1284_v15 = vpop.f32.mrb[3].mxu1 }
 0x44a   : > { %v838_v16 = vmax.f32 %v835_v14, 0.0 }
 0x44c   : > { %1318 = vmatmul.mubr.f32.vlgmr.msra.gmra.mrb[4].mxu1 %v838_v16 }
 0x51f   : > { %v926_v20 = vpop.f32.mrb[4].mxu1 }
 0x520   : > { %v927_v21 = vadd.f32 %v1087_v5, %v926_v20  ;;  %v1319_v22 = vpop.f32.mrb[5].mxu1 }
 0x522   : > { %v930_v23 = vmax.f32 %v927_v21, 0.0 }
 0x524   : > { %1337 = vmatmul.mubr.msk.f32.vlgmr.msra.gmra.mrb[6].mxu0 %vm585_vm3, %v930_v23 }
 0x5f7   : > { %v1013_v25 = vpop.f32.mrb[6].mxu0 }
 0x5f8   : > { %v1014_v26 = vadd.f32 %v1088_v24, %v1013_v25  ;;  %v1338_v27 = vpop.f32.mrb[7].mxu0 }
 0x5fa   : > { %1017 = vst [vmem:[%s382_s17] sm:$0xff] %v1014_v26 }
 0x5fb PF: > { %s22_s19 = sadd.s32 1, %s1464_s19  }
 0x5fc   : > { %p19_p4 = scmp.ge.s32.totalorder %s22_s19, 4  }
 0x5fe   :  { %21 = sbr.rel (!%p19_p4) target bundleno = 2 (0x2), region = 94 }

</bundles_post_ra>
